<compile_context>
chip_gen: v6e
topology: v6e:2x2x1
jax: 0.10.0
libtpu: 0.0.40
codegen_flags: <defaults>
</compile_context>

<pallas_src>
import functools

import jax
import jax.numpy as jnp
from jax.experimental import pallas as pl
from jax.experimental.pallas import tpu as pltpu

LANE = 128


def _round_up(v, m):
    return ((v + m - 1) // m) * m


def _pad2(a, rows, cols):
    return jnp.pad(a, ((0, rows - a.shape[0]), (0, cols - a.shape[1])))


# ----------------------------------------------------------------------------
# Fused Pallas kernel (whole forward pass, single grid step)
# ----------------------------------------------------------------------------
def _make_gcn2_fused_kernel(num_layers):
    """Kernel refs: S, X, (W_l, b_l)*L, Wp_l*L, bp, out."""

    def kernel(*refs):
        s_ref, x_ref = refs[0], refs[1]
        pos = 2
        layer_wb = []
        for _ in range(num_layers):
            layer_wb.append((refs[pos], refs[pos + 1]))
            pos += 2
        pred_w_refs = refs[pos:pos + num_layers]
        pos += num_layers
        bp_ref = refs[pos]
        o_ref = refs[pos + 1]

        # bf16 MXU operands, f32 accumulation, f32 elementwise epilogue.
        s = s_ref[...].astype(jnp.bfloat16)
        h = x_ref[...].astype(jnp.bfloat16)
        out = None
        for (w_ref, b_ref), wp_ref in zip(layer_wb, pred_w_refs):
            # Reassociated: S @ (h @ W) == (S @ h) @ W (cheaper here since F <= H).
            # TODO(synk): for real GCN inputs with F >> H compute (h @ W) first.
            sh = jnp.dot(s, h, preferred_element_type=jnp.float32)
            pre = jnp.dot(sh.astype(jnp.bfloat16), w_ref[...],
                          preferred_element_type=jnp.float32) + b_ref[...]
            h = jnp.maximum(pre, 0.0).astype(jnp.bfloat16)
            # This layer's contribution to the concat-Linear (split matmul).
            c = jnp.dot(h, wp_ref[...], preferred_element_type=jnp.float32)
            out = c if out is None else out + c
        o_ref[...] = out + bp_ref[...]

    return kernel


# ----------------------------------------------------------------------------
# One-time parameter packing (hoisted out of the per-call path)
# ----------------------------------------------------------------------------
def prepare_params(params, compute_dtype=jnp.bfloat16):
    """Cast weights to bf16, split pred_w per layer, pad only the output lane dim."""
    hiddens = [w.shape[1] for (w, _) in params["gcn"]]
    out_dim = params["pred_w"].shape[1]
    o_pad = _round_up(out_dim, LANE)

    gcn = [(w.astype(compute_dtype), b.reshape(1, -1).astype(jnp.float32))
           for (w, b) in params["gcn"]]

    pred = []
    off = 0
    for h in hiddens:
        wp = params["pred_w"][off:off + h]
        off += h
        pred.append(_pad2(wp, h, o_pad).astype(compute_dtype))

    bp = jnp.pad(params["pred_b"], (0, o_pad - out_dim)).reshape(1, o_pad)
    prepped = {"gcn": gcn, "pred": pred, "bp": bp.astype(jnp.float32)}
    return prepped, out_dim


# ----------------------------------------------------------------------------
# Forward: no per-call padding/reshaping — just the fused kernel + one slice
# ----------------------------------------------------------------------------
@functools.partial(jax.jit, static_argnames=("out_dim",))
def gcn2_forward(x, support, prepped, out_dim):
    n = x.shape[0]
    num_layers = len(prepped["gcn"])
    o_pad = prepped["bp"].shape[1]

    # support / x passed unpadded: full-array blocks are exempt from (8,128).
    args = [support, x]
    for (w, b) in prepped["gcn"]:
        args += [w, b]
    args += list(prepped["pred"])
    args.append(prepped["bp"])

    in_specs = [pl.BlockSpec(tuple(a.shape), lambda i: (0, 0)) for a in args]

    out_pad = pl.pallas_call(
        _make_gcn2_fused_kernel(num_layers),
        out_shape=jax.ShapeDtypeStruct((n, o_pad), jnp.float32),
        grid_spec=pltpu.PrefetchScalarGridSpec(
            num_scalar_prefetch=0,
            grid=(1,),
            in_specs=in_specs,
            out_specs=pl.BlockSpec((n, o_pad), lambda i: (0, 0)),
        ),
        compiler_params=pltpu.CompilerParams(
            dimension_semantics=("arbitrary",),
        ),
    )(*args)

    return out_pad[:, :out_dim]


# ----------------------------------------------------------------------------
# Deterministic parameter init (glorot-uniform-ish, fixed key)
# ----------------------------------------------------------------------------
def init_params(key, input_dim, hiddens, output_dim):
    params = {"gcn": []}
    dims = [input_dim] + list(hiddens)
    for i in range(len(hiddens)):
        key, kw = jax.random.split(key)
        fan_in, fan_out = dims[i], dims[i + 1]
        lim = (6.0 / (fan_in + fan_out)) ** 0.5
        w = jax.random.uniform(kw, (fan_in, fan_out), jnp.float32, -lim, lim)
        b = jnp.zeros((fan_out,), jnp.float32)
        params["gcn"].append((w, b))
    key, kp, kb = jax.random.split(key, 3)
    cat_dim = sum(hiddens)
    lim = (1.0 / cat_dim) ** 0.5
    # nn.Linear weight is [out, in]; stored here pre-transposed to [in, out].
    params["pred_w"] = jax.random.uniform(
        kp, (cat_dim, output_dim), jnp.float32, -lim, lim
    )
    params["pred_b"] = jax.random.uniform(
        kb, (output_dim,), jnp.float32, -lim, lim
    )
    return params


# ----------------------------------------------------------------------------
# Pure-JAX references for verification
# ----------------------------------------------------------------------------
def gcn2_reference(x, support, params):
    """Exact f32 reference (module semantics)."""
    x_all = []
    h = x
    for (w, b) in params["gcn"]:
        h = jnp.maximum(support @ (h @ w) + b[None, :], 0.0)
        x_all.append(h)
    emb = jnp.concatenate(x_all, axis=-1)
    return emb @ params["pred_w"] + params["pred_b"][None, :]


def gcn2_reference_bf16(x, support, params):
    """Reference using the same bf16-operand / f32-accum arithmetic as the kernel."""
    s = support.astype(jnp.bfloat16)
    h = x.astype(jnp.bfloat16)
    x_all = []
    for (w, b) in params["gcn"]:
        sh = jnp.dot(s, h, preferred_element_type=jnp.float32)
        pre = jnp.dot(sh.astype(jnp.bfloat16), w.astype(jnp.bfloat16),
                      preferred_element_type=jnp.float32) + b[None, :]
        h = jnp.maximum(pre, 0.0).astype(jnp.bfloat16)
        x_all.append(h)
    emb = jnp.concatenate(x_all, axis=-1)
    return (jnp.dot(emb, params["pred_w"].astype(jnp.bfloat16),
                    preferred_element_type=jnp.float32)
            + params["pred_b"][None, :])


if __name__ == "__main__":
    # Small synthetic graph: N nodes, input_dim features.
    N, INPUT_DIM, OUTPUT_DIM = 64, 16, 8
    HIDDENS = [32, 32]  # args.hiddens = "32-32"

    key = jax.random.PRNGKey(0)
    kx, ka, kp = jax.random.split(key, 3)

    x = jax.random.normal(kx, (N, INPUT_DIM), jnp.float32)

    # Row-normalized adjacency with self-loops (typical GCN "support").
    adj = (jax.random.uniform(ka, (N, N)) < 0.1).astype(jnp.float32)
    adj = jnp.maximum(adj, adj.T) + jnp.eye(N, dtype=jnp.float32)
    support = adj / jnp.sum(adj, axis=1, keepdims=True)

    params = init_params(kp, INPUT_DIM, HIDDENS, OUTPUT_DIM)
    prepped, out_dim = prepare_params(params)   # one-time; off the hot path

    out = gcn2_forward(x, support, prepped, out_dim)
    out = jax.block_until_ready(out)
    assert out.shape == (N, OUTPUT_DIM)

    ref_bf16 = gcn2_reference_bf16(x, support, params)
    ref_f32 = gcn2_reference(x, support, params)
    err_bf16 = float(jnp.max(jnp.abs(out - ref_bf16)))
    err_f32 = float(jnp.max(jnp.abs(out - ref_f32)))
    # Tight check vs. arithmetic-matched reference; loose check vs. exact f32
    # reference (bf16 MXU operands lose ~3 decimal digits of mantissa).
    assert jnp.allclose(out, ref_bf16, atol=5e-3, rtol=5e-3), err_bf16
    assert jnp.allclose(out, ref_f32, atol=3e-2, rtol=3e-2), err_f32

    print("KERNEL_OK")
</pallas_src>

<mosaic_0001>
module attributes {stable_mosaic.version = 11 : i64} {
  func.func @kernel(%arg0: i32, %arg1: memref<64x64xf32, #tpu.memory_space<vmem>>, %arg2: memref<64x16xf32, #tpu.memory_space<vmem>>, %arg3: memref<16x32xbf16, #tpu.memory_space<vmem>>, %arg4: memref<1x32xf32, #tpu.memory_space<vmem>>, %arg5: memref<32x32xbf16, #tpu.memory_space<vmem>>, %arg6: memref<1x32xf32, #tpu.memory_space<vmem>>, %arg7: memref<32x128xbf16, #tpu.memory_space<vmem>>, %arg8: memref<32x128xbf16, #tpu.memory_space<vmem>>, %arg9: memref<1x128xf32, #tpu.memory_space<vmem>>, %arg10: memref<64x128xf32, #tpu.memory_space<vmem>>) attributes {dimension_semantics = [#tpu.dimension_semantics<arbitrary>], iteration_bounds = array<i64: 1>, scalar_prefetch = 0 : i64, scratch_operands = 0 : i64, tpu.core_type = #tpu.core_type<tc>, window_params = [{pipeline_mode = #tpu.pipeline_mode<synchronous>, transform_indices = @transform_0, window_bounds = array<i64: 64, 64>}, {pipeline_mode = #tpu.pipeline_mode<synchronous>, transform_indices = @transform_1, window_bounds = array<i64: 64, 16>}, {pipeline_mode = #tpu.pipeline_mode<synchronous>, transform_indices = @transform_2, window_bounds = array<i64: 16, 32>}, {pipeline_mode = #tpu.pipeline_mode<synchronous>, transform_indices = @transform_3, window_bounds = array<i64: 1, 32>}, {pipeline_mode = #tpu.pipeline_mode<synchronous>, transform_indices = @transform_4, window_bounds = array<i64: 32, 32>}, {pipeline_mode = #tpu.pipeline_mode<synchronous>, transform_indices = @transform_5, window_bounds = array<i64: 1, 32>}, {pipeline_mode = #tpu.pipeline_mode<synchronous>, transform_indices = @transform_6, window_bounds = array<i64: 32, 128>}, {pipeline_mode = #tpu.pipeline_mode<synchronous>, transform_indices = @transform_7, window_bounds = array<i64: 32, 128>}, {pipeline_mode = #tpu.pipeline_mode<synchronous>, transform_indices = @transform_8, window_bounds = array<i64: 1, 128>}, {pipeline_mode = #tpu.pipeline_mode<synchronous>, transform_indices = @transform_9, window_bounds = array<i64: 64, 128>}]} {
    %c0 = arith.constant 0 : index
    %c0_0 = arith.constant 0 : index
    %0 = vector.load %arg1[%c0, %c0_0] : memref<64x64xf32, #tpu.memory_space<vmem>>, vector<64x64xf32>
    %1 = arith.truncf %0 : vector<64x64xf32> to vector<64x64xbf16>
    %c0_1 = arith.constant 0 : index
    %c0_2 = arith.constant 0 : index
    %2 = vector.load %arg2[%c0_1, %c0_2] : memref<64x16xf32, #tpu.memory_space<vmem>>, vector<64x16xf32>
    %3 = arith.truncf %2 : vector<64x16xf32> to vector<64x16xbf16>
    %cst = arith.constant dense<0.000000e+00> : vector<64x16xf32>
    %4 = tpu.matmul %1, %3, %cst {dimension_numbers = #tpu.dot_dimension_numbers<[1], [0], [0], [1], [0, 0, 1, 1], [], []>} : vector<64x64xbf16>, vector<64x16xbf16>, vector<64x16xf32> -> vector<64x16xf32>
    %5 = arith.truncf %4 : vector<64x16xf32> to vector<64x16xbf16>
    %c0_3 = arith.constant 0 : index
    %c0_4 = arith.constant 0 : index
    %6 = vector.load %arg3[%c0_3, %c0_4] : memref<16x32xbf16, #tpu.memory_space<vmem>>, vector<16x32xbf16>
    %cst_5 = arith.constant dense<0.000000e+00> : vector<64x32xf32>
    %7 = tpu.matmul %5, %6, %cst_5 {dimension_numbers = #tpu.dot_dimension_numbers<[1], [0], [0], [1], [0, 0, 1, 1], [], []>} : vector<64x16xbf16>, vector<16x32xbf16>, vector<64x32xf32> -> vector<64x32xf32>
    %c0_6 = arith.constant 0 : index
    %c0_7 = arith.constant 0 : index
    %8 = vector.load %arg4[%c0_6, %c0_7] : memref<1x32xf32, #tpu.memory_space<vmem>>, vector<1x32xf32>
    %9 = vector.broadcast %8 : vector<1x32xf32> to vector<64x32xf32>
    %10 = arith.addf %7, %9 : vector<64x32xf32>
    %cst_8 = arith.constant 0.000000e+00 : f32
    %11 = vector.broadcast %cst_8 : f32 to vector<64x32xf32>
    %12 = arith.maximumf %10, %11 : vector<64x32xf32>
    %13 = arith.truncf %12 : vector<64x32xf32> to vector<64x32xbf16>
    %c0_9 = arith.constant 0 : index
    %c0_10 = arith.constant 0 : index
    %14 = vector.load %arg7[%c0_9, %c0_10] : memref<32x128xbf16, #tpu.memory_space<vmem>>, vector<32x128xbf16>
    %cst_11 = arith.constant dense<0.000000e+00> : vector<64x128xf32>
    %15 = tpu.matmul %13, %14, %cst_11 {dimension_numbers = #tpu.dot_dimension_numbers<[1], [0], [0], [1], [0, 0, 1, 1], [], []>} : vector<64x32xbf16>, vector<32x128xbf16>, vector<64x128xf32> -> vector<64x128xf32>
    %cst_12 = arith.constant dense<0.000000e+00> : vector<64x32xf32>
    %16 = tpu.matmul %1, %13, %cst_12 {dimension_numbers = #tpu.dot_dimension_numbers<[1], [0], [0], [1], [0, 0, 1, 1], [], []>} : vector<64x64xbf16>, vector<64x32xbf16>, vector<64x32xf32> -> vector<64x32xf32>
    %17 = arith.truncf %16 : vector<64x32xf32> to vector<64x32xbf16>
    %c0_13 = arith.constant 0 : index
    %c0_14 = arith.constant 0 : index
    %18 = vector.load %arg5[%c0_13, %c0_14] : memref<32x32xbf16, #tpu.memory_space<vmem>>, vector<32x32xbf16>
    %cst_15 = arith.constant dense<0.000000e+00> : vector<64x32xf32>
    %19 = tpu.matmul %17, %18, %cst_15 {dimension_numbers = #tpu.dot_dimension_numbers<[1], [0], [0], [1], [0, 0, 1, 1], [], []>} : vector<64x32xbf16>, vector<32x32xbf16>, vector<64x32xf32> -> vector<64x32xf32>
    %c0_16 = arith.constant 0 : index
    %c0_17 = arith.constant 0 : index
    %20 = vector.load %arg6[%c0_16, %c0_17] : memref<1x32xf32, #tpu.memory_space<vmem>>, vector<1x32xf32>
    %21 = vector.broadcast %20 : vector<1x32xf32> to vector<64x32xf32>
    %22 = arith.addf %19, %21 : vector<64x32xf32>
    %cst_18 = arith.constant 0.000000e+00 : f32
    %23 = vector.broadcast %cst_18 : f32 to vector<64x32xf32>
    %24 = arith.maximumf %22, %23 : vector<64x32xf32>
    %25 = arith.truncf %24 : vector<64x32xf32> to vector<64x32xbf16>
    %c0_19 = arith.constant 0 : index
    %c0_20 = arith.constant 0 : index
    %26 = vector.load %arg8[%c0_19, %c0_20] : memref<32x128xbf16, #tpu.memory_space<vmem>>, vector<32x128xbf16>
    %cst_21 = arith.constant dense<0.000000e+00> : vector<64x128xf32>
    %27 = tpu.matmul %25, %26, %cst_21 {dimension_numbers = #tpu.dot_dimension_numbers<[1], [0], [0], [1], [0, 0, 1, 1], [], []>} : vector<64x32xbf16>, vector<32x128xbf16>, vector<64x128xf32> -> vector<64x128xf32>
    %28 = arith.addf %15, %27 : vector<64x128xf32>
    %c0_22 = arith.constant 0 : index
    %c0_23 = arith.constant 0 : index
    %29 = vector.load %arg9[%c0_22, %c0_23] : memref<1x128xf32, #tpu.memory_space<vmem>>, vector<1x128xf32>
    %30 = vector.broadcast %29 : vector<1x128xf32> to vector<64x128xf32>
    %31 = arith.addf %28, %30 : vector<64x128xf32>
    %c0_24 = arith.constant 0 : index
    %c0_25 = arith.constant 0 : index
    %32 = vector.load %arg10[%c0_24, %c0_25] : memref<64x128xf32, #tpu.memory_space<vmem>>, vector<64x128xf32>
    tpu.vector_store %arg10[%c0_24, %c0_25], %31 {strides = array<i32>} : memref<64x128xf32, #tpu.memory_space<vmem>>, vector<64x128xf32>,
    return
  }
  func.func @transform_0(%arg0: i32) -> (i32, i32) {
    %c0_i32 = arith.constant 0 : i32
    %c0_i32_0 = arith.constant 0 : i32
    %c0_i32_1 = arith.constant 0 : i32
    return %c0_i32, %c0_i32_0 : i32, i32
  }
  func.func @transform_1(%arg0: i32) -> (i32, i32) {
    %c0_i32 = arith.constant 0 : i32
    %c0_i32_0 = arith.constant 0 : i32
    %c0_i32_1 = arith.constant 0 : i32
    return %c0_i32, %c0_i32_0 : i32, i32
  }
  func.func @transform_2(%arg0: i32) -> (i32, i32) {
    %c0_i32 = arith.constant 0 : i32
    %c0_i32_0 = arith.constant 0 : i32
    %c0_i32_1 = arith.constant 0 : i32
    return %c0_i32, %c0_i32_0 : i32, i32
  }
  func.func @transform_3(%arg0: i32) -> (i32, i32) {
    %c0_i32 = arith.constant 0 : i32
    %c0_i32_0 = arith.constant 0 : i32
    %c0_i32_1 = arith.constant 0 : i32
    return %c0_i32, %c0_i32_0 : i32, i32
  }
  func.func @transform_4(%arg0: i32) -> (i32, i32) {
    %c0_i32 = arith.constant 0 : i32
    %c0_i32_0 = arith.constant 0 : i32
    %c0_i32_1 = arith.constant 0 : i32
    return %c0_i32, %c0_i32_0 : i32, i32
  }
  func.func @transform_5(%arg0: i32) -> (i32, i32) {
    %c0_i32 = arith.constant 0 : i32
    %c0_i32_0 = arith.constant 0 : i32
    %c0_i32_1 = arith.constant 0 : i32
    return %c0_i32, %c0_i32_0 : i32, i32
  }
  func.func @transform_6(%arg0: i32) -> (i32, i32) {
    %c0_i32 = arith.constant 0 : i32
    %c0_i32_0 = arith.constant 0 : i32
    %c0_i32_1 = arith.constant 0 : i32
    return %c0_i32, %c0_i32_0 : i32, i32
  }
  func.func @transform_7(%arg0: i32) -> (i32, i32) {
    %c0_i32 = arith.constant 0 : i32
    %c0_i32_0 = arith.constant 0 : i32
    %c0_i32_1 = arith.constant 0 : i32
    return %c0_i32, %c0_i32_0 : i32, i32
  }
  func.func @transform_8(%arg0: i32) -> (i32, i32) {
    %c0_i32 = arith.constant 0 : i32
    %c0_i32_0 = arith.constant 0 : i32
    %c0_i32_1 = arith.constant 0 : i32
    return %c0_i32, %c0_i32_0 : i32, i32
  }
  func.func @transform_9(%arg0: i32) -> (i32, i32) {
    %c0_i32 = arith.constant 0 : i32
    %c0_i32_0 = arith.constant 0 : i32
    %c0_i32_1 = arith.constant 0 : i32
    return %c0_i32, %c0_i32_0 : i32, i32
  }
}

</mosaic_0001>

<bundles_post_ra>
// kernel: gcn2_forward.1
= control target key start
LH: loop header
LB: loop body
LE: loop exit
PB: predicated region body
PF: predicated region fallthrough
CT: control target
= control target key end

     0   :  { %14 = vsyncpa [#allocation3], 0  ;;  %s1096_s0 = inlined_call_operand.vmem [shape: f32[64,64], index: 0, kind: input, shape index: {}]   ;;  %s1097_s1 = inlined_call_operand.vmem [shape: f32[64,16], index: 1, kind: input, shape index: {}]   ;;  %s1098_s2 = inlined_call_operand.hbm [shape: bf16[16,32], index: 2, kind: input, shape index: {}]   ;;  %s1099_s3 = inlined_call_operand.vmem [shape: f32[1,32], index: 3, kind: input, shape index: {}]   ;;  %s1100_s4 = inlined_call_operand.vmem [shape: bf16[32,32], index: 4, kind: input, shape index: {}]   ;;  %s1101_s5 = inlined_call_operand.vmem [shape: f32[1,32], index: 5, kind: input, shape index: {}]   ;;  %s1102_s6 = inlined_call_operand.hbm [shape: bf16[32,128], index: 6, kind: input, shape index: {}]   ;;  %s1103_s7 = inlined_call_operand.hbm [shape: bf16[32,128], index: 7, kind: input, shape index: {}]   ;;  %s1104_s8 = inlined_call_operand.vmem [shape: f32[1,128], index: 8, kind: input, shape index: {}]   ;;  %s1105_s9 = inlined_call_operand.vmem [shape: f32[64,128], index: 9, kind: output, shape index: {}]  }
   0x1   :  { %15 = vsyncpa [#allocation5], 0  ;;  %s913_s30 = smov [#allocation4]   ;;  %s914_s11 = smov [#allocation2]  }
   0x2   :  { %s43_s10 = sshll.u32 %s913_s30, 4  ;;  %s25_s12 = sshll.u32 %s914_s11, 4  ;;  %s44_s10 = int_to_ptr.vmem [resolvable:$true] %s43_s10  ;;  %s26_s12 = int_to_ptr.vmem [resolvable:$true] %s25_s12 }
   0x3   :  { %s857_s13 = scalar_lea.vmem %s44_s10, 256  ;;  %p862_p1 = scmp.lt.s32.totalorder %s44_s10, %s44_s10 }
   0x4   :  { %p858_p0 = scmp.ne.s32.totalorder %s44_s10, %s857_s13  ;;  %p863_p2 = scmp.lt.s32.totalorder %s857_s13, %s857_s13 }
   0x6   :  { %p864_p3 = por %p863_p2, %p862_p1 }
   0x8   :  { %p865_p4 = pnand %p864_p3, %p858_p0 }
   0xa   :  { %868 = shalt.err (!%p865_p4)
}
   0xb   :  { %s915_s14 = smov 64   ;;  %s916_s15 = smov 4  }
   0xc   :  { %49 = dma.hbm_to_vmem [thread:$0]  %s1102_s6, 256, %s44_s10, [#allocation5], %s915_s14, %s915_s14, %s916_s15  }
   0xd   :  { %s877_s18 = scalar_lea.vmem %s26_s12, 128  ;;  %p882_p6 = scmp.lt.s32.totalorder %s26_s12, %s26_s12 }
   0xe   :  { %p878_p5 = scmp.ne.s32.totalorder %s26_s12, %s877_s18  ;;  %p883_p7 = scmp.lt.s32.totalorder %s877_s18, %s877_s18 }
  0x10   :  { %p884_p8 = por %p883_p7, %p882_p6 }
  0x12   :  { %p885_p9 = pnand %p884_p8, %p878_p5 }
  0x14   :  { %888 = shalt.err (!%p885_p9)
}
  0x15   :  { %31 = dma.hbm_to_vmem [thread:$0]  %s1098_s2, 128, %s26_s12, [#allocation3], %s915_s14, %s915_s14, %s916_s15  }
  0x16   :  { %s917_s21 = smov [#allocation6]  }
  0x17   :  { %s55_s22 = sshll.u32 %s917_s21, 4  ;;  %s56_s22 = int_to_ptr.vmem [resolvable:$true] %s55_s22 }
  0x18   :  { %s897_s23 = scalar_lea.vmem %s56_s22, 256  ;;  %p902_p11 = scmp.lt.s32.totalorder %s56_s22, %s56_s22 }
  0x19   :  { %p898_p10 = scmp.ne.s32.totalorder %s56_s22, %s897_s23  ;;  %p903_p12 = scmp.lt.s32.totalorder %s897_s23, %s897_s23 }
  0x1b   :  { %p904_p13 = por %p903_p12, %p902_p11 }
  0x1d   :  { %p905_p0 = pnand %p904_p13, %p898_p10 }
  0x1f   :  { %908 = shalt.err (!%p905_p0)
}
  0x20   :  { %61 = dma.hbm_to_vmem [thread:$0]  %s1103_s7, 256, %s56_s22, [#allocation5], %s915_s14, %s915_s14, %s916_s15  }
  0x21   :  { %909 = dma.done.wait [#allocation3], 128  }
  0x22   :  { %910 = vsyncadd [#allocation3], 4294967168 }
  0x23   :  { %911 = dma.done.wait [#allocation5], 512  }
  0x24   :  { %912 = vsyncadd [#allocation5], 4294966784  ;;  %v92_v0 = vld [vmem:[%s1097_s1 + $0x30] sm:$0xff]  ;;  %v93_v1 = vld [vmem:[%s1097_s1 + $0x38] sm:$0xff]  ;;  %vm98_vm0 = vcmask 523264   ;;  %vm195_vm1 = vcmask 130048  }
  0x25   :  { %v90_v2 = vld [vmem:[%s1097_s1 + $0x20] sm:$0xff]  ;;  %v97_v3 = vpack.c.bf16 %v93_v1, %v92_v0  ;;  %v91_v4 = vld [vmem:[%s1097_s1 + $0x28] sm:$0xff]  ;;  %v88_v6 = vld [vmem:[%s1097_s1 + $0x10] sm:$0xff]  ;;  %vm381_vm2 = vcmask 261120  }
  0x26   :  { %v96_v5 = vpack.c.bf16 %v91_v4, %v90_v2  ;;  %v89_v7 = vld [vmem:[%s1097_s1 + $0x18] sm:$0xff]  ;;  %v74_v8 = vld [vmem:[%s1096_s0] sm:$0xff]  ;;  %v75_v9 = vld [vmem:[%s1096_s0 + $0x8] sm:$0xff] }
  0x27   :  { %755 = vmatprep.subr.bf16.mxu0 %v97_v3  ;;  %v86_v10 = vld [vmem:[%s1097_s1] sm:$0xff]  ;;  %v82_v11 = vpack.c.bf16 %v75_v9, %v74_v8  ;;  %v95_v12 = vpack.c.bf16 %v89_v7, %v88_v6  ;;  %v87_v13 = vld [vmem:[%s1097_s1 + $0x8] sm:$0xff]  ;;  %v76_v15 = vld [vmem:[%s1096_s0 + $0x10] sm:$0xff] }
  0x28   :  { %756 = vmatpush3.bf16.msra.mxu0 %v97_v3  ;;  %v94_v14 = vpack.c.bf16 %v87_v13, %v86_v10  ;;  %v77_v16 = vld [vmem:[%s1096_s0 + $0x18] sm:$0xff]  ;;  %v78_v17 = vld [vmem:[%s1096_s0 + $0x20] sm:$0xff]  ;;  %v79_v18 = vld [vmem:[%s1096_s0 + $0x28] sm:$0xff] }
  0x29   :  { %757 = vmatprep.subr.bf16.mxu0 %v96_v5  ;;  %763 = vmatprep.mubr.msk.bf16.mxu0 %vm98_vm0, %v82_v11  ;;  %v1020_v19 = vpack.c.bf16 %v77_v16, %v76_v15  ;;  %v1022_v20 = vpack.c.bf16 %v79_v18, %v78_v17  ;;  %v80_v21 = vld [vmem:[%s1096_s0 + $0x30] sm:$0xff]  ;;  %v81_v22 = vld [vmem:[%s1096_s0 + $0x38] sm:$0xff]  ;;  %v842_v24 = vld [vmem:[#allocation2] sm:$0xff]  }
  0x2a   :  { %v1034_v23 = vpack.c.bf16 %v81_v22, %v80_v21  ;;  %771 = vmatprep.subr.bf16.mxu1 %v842_v24  ;;  %v843_v37 = vld [vmem:[%s1100_s4 + $0x8] sm:$0xff]   ;;  %v686_v43 = vld [vmem:[%s1099_s3] ss:$0 sm:$0xff]  ;;  %v845_v4 = vld [vmem:[#allocation4 + $0x8] sm:$0xff]  }
  0x2b   :  { %772 = vmatpush3.bf16.msra.mxu1 %v842_v24  ;;  %v844_v3 = vld [vmem:[%s1100_s4] sm:$0xff]  }
  0x2c   :  { %758 = vmatpush3.bf16.msra.mxu0 %v96_v5  ;;  %v847_v18 = vld [vmem:[#allocation6 + $0x8] sm:$0xff]  }
  0x2d   :  { %759 = vmatprep.subr.bf16.mxu0 %v95_v12  ;;  %v696_v22 = vld [vmem:[%s1101_s5] ss:$0 sm:$0xff] }
  0x30   :  { %760 = vmatpush3.bf16.msra.mxu0 %v95_v12  ;;  %v846_v12 = vld [vmem:[#allocation4] sm:$0xff]  }
  0x31   :  { %761 = vmatprep.subr.bf16.mxu0 %v94_v14 }
  0x34   :  { %762 = vmatpush3.bf16.msra.mxu0 %v94_v14 }
  0x35   :  { %797 = vmatprep.subr.bf16.mxu0 %v843_v37 }
  0x37   :  { %764 = vmatmul.mubr.msk.bf16.vlgmr.msra.gmra.mxu0 %vm98_vm0, %v1020_v19 }
  0x38   :  { %767 = vmatprep.mubr.msk.bf16.mxu0 %vm98_vm0, %v1022_v20  ;;  %798 = vmatpush3.bf16.msra.mxu0 %v843_v37 }
  0x39   :  { %799 = vmatprep.subr.bf16.mxu0 %v844_v3 }
  0x3c   :  { %800 = vmatpush3.bf16.msra.mxu0 %v844_v3 }
  0x3d   :  { %821 = vmatprep.subr.bf16.mxu0 %v845_v4 }
  0x3f   :  { %768 = vmatmul.mubr.msk.bf16.gmra.mxu0 %vm98_vm0, %v1034_v23 }
  0xf7   :  { %v765_v25 = vpop.f32.mrf.mxu0 }
  0xf9   :  { %v145_v26 = vpop.f32.mrf.mxu0 }
  0xfb   :  { %v766_v27 = vpop.f32.mrf.mxu0 }
  0xfc   :  { %v177_v30 = vpack.c.bf16 %v766_v27, %v765_v25 }
  0xfd   :  { %v148_v28 = vpop.f32.mrf.mxu0 }
  0xfe   :  { %v176_v29 = vpack.c.bf16 %v148_v28, %v145_v26 }
  0xff   :  { %v769_v31 = vpop.f32.mrf.mxu0 }
 0x100   :  { %773 = vmatprep.mubr.msk.bf16.mxu1 %vm195_vm1, %v176_v29 }
 0x101   :  { %v161_v32 = vpop.f32.mrf.mxu0  ;;  %774 = vmatmul.mubr.msk.bf16.vlgmr.msra.gmra.mxu1 %vm195_vm1, %v177_v30 }
 0x103   :  { %v770_v33 = vpop.f32.mrf.mxu0 }
 0x104   :  { %v179_v36 = vpack.c.bf16 %v770_v33, %v769_v31 }
 0x105   :  { %v164_v34 = vpop.f32.mrf.mxu0 }
 0x106   :  { %v178_v35 = vpack.c.bf16 %v164_v34, %v161_v32 }
 0x108   :  { %777 = vmatprep.mubr.msk.bf16.mxu1 %vm195_vm1, %v178_v35 }
 0x109   :  { %778 = vmatmul.mubr.msk.bf16.gmra.mxu1 %vm195_vm1, %v179_v36 }
 0x10a   :  { %789 = vmatprep.mubr.msk.bf16.mxu1 %vm98_vm0, %v82_v11 }
 0x1c1   :  { %v775_v38 = vpop.f32.mrf.mxu1 }
 0x1c2   :  { %v251_v54 = vadd.f32 %v775_v38, %v686_v43 }
 0x1c3   :  { %v242_v39 = vpop.f32.mrf.mxu1 }
 0x1c4   :  { %v275_v61 = vmax.f32 %v251_v54, 0.0  ;;  %v243_v62 = vadd.f32 %v686_v43, %v242_v39  ;;  %v715_v54 = vld [vmem:[%s1104_s8] ss:$0 sm:$0xff] }
 0x1c5   :  { %v776_v40 = vpop.f32.mrf.mxu1 }
 0x1c6   :  { %v254_v50 = vadd.f32 %v776_v40, %v686_v43  ;;  %v273_v1 = vmax.f32 %v243_v62, 0.0 }
 0x1c7   :  { %v245_v41 = vpop.f32.mrf.mxu1 }
 0x1c8   :  { %v276_v58 = vmax.f32 %v254_v50, 0.0  ;;  %v246_v59 = vadd.f32 %v686_v43, %v245_v41 }
 0x1c9   :  { %v779_v42 = vpop.f32.mrf.mxu1 }
 0x1ca   :  { %v267_v45 = vadd.f32 %v779_v42, %v686_v43  ;;  %v282_v63 = vpack.c.bf16 %v276_v58, %v275_v61  ;;  %v274_v0 = vmax.f32 %v246_v59, 0.0 }
 0x1cb   :  { %v258_v44 = vpop.f32.mrf.mxu1 }
 0x1cc   :  { %v259_v47 = vadd.f32 %v686_v43, %v258_v44  ;;  %v279_v51 = vmax.f32 %v267_v45, 0.0  ;;  %v281_v2 = vpack.c.bf16 %v274_v0, %v273_v1 }
 0x1cd   :  { %v780_v46 = vpop.f32.mrf.mxu1 }
 0x1ce   :  { %v270_v48 = vadd.f32 %v780_v46, %v686_v43  ;;  %v277_v55 = vmax.f32 %v259_v47, 0.0 }
 0x1cf   :  { %v261_v49 = vpop.f32.mrf.mxu1 }
 0x1d0   :  { %v280_v52 = vmax.f32 %v270_v48, 0.0  ;;  %v262_v53 = vadd.f32 %v686_v43, %v261_v49 }
 0x1d2   :  { %v284_v56 = vpack.c.bf16 %v280_v52, %v279_v51  ;;  %v278_v57 = vmax.f32 %v262_v53, 0.0 }
 0x1d4   :  { %v283_v60 = vpack.c.bf16 %v278_v57, %v277_v55  ;;  %781 = vmatprep.subr.bf16.mxu1 %v284_v56 }
 0x1d5   :  { %782 = vmatpush3.bf16.msra.mxu1 %v284_v56 }
 0x1d6   :  { %783 = vmatprep.subr.bf16.mxu1 %v283_v60 }
 0x1d9   :  { %784 = vmatpush3.bf16.msra.mxu1 %v283_v60 }
 0x1da   :  { %785 = vmatprep.subr.bf16.mxu1 %v282_v63 }
 0x1dd   :  { %786 = vmatpush3.bf16.msra.mxu1 %v282_v63 }
 0x1de   :  { %787 = vmatprep.subr.bf16.mxu1 %v281_v2 }
 0x1e1   :  { %788 = vmatpush3.bf16.msra.mxu1 %v281_v2 }
 0x1e2   :  { %833 = vmatprep.subr.bf16.mxu1 %v843_v37 }
 0x1e4   :  { %790 = vmatmul.mubr.msk.bf16.vlgmr.msra.gmra.mxu1 %vm98_vm0, %v1020_v19  ;;  %v848_v19 = vld [vmem:[#allocation6] sm:$0xff]  }
 0x1e5   :  { %793 = vmatprep.mubr.msk.bf16.mxu1 %vm98_vm0, %v1022_v20  ;;  %835 = vmatpush3.bf16.msra.mxu1 %v843_v37 }
 0x1e6   :  { %834 = vmatprep.subr.bf16.mxu1 %v844_v3 }
 0x1e9   :  { %836 = vmatpush3.bf16.msra.mxu1 %v844_v3 }
 0x1ea   :  { %809 = vmatprep.subr.bf16.mxu1 %v847_v18 }
 0x1ec   :  { %794 = vmatmul.mubr.msk.bf16.gmra.mxu1 %vm98_vm0, %v1034_v23 }
 0x2a4   :  { %v791_v5 = vpop.f32.mrf.mxu1 }
 0x2a6   :  { %v323_v6 = vpop.f32.mrf.mxu1 }
 0x2a8   :  { %v792_v7 = vpop.f32.mrf.mxu1 }
 0x2a9   :  { %v355_v10 = vpack.c.bf16 %v792_v7, %v791_v5 }
 0x2aa   :  { %v326_v8 = vpop.f32.mrf.mxu1 }
 0x2ab   :  { %v354_v9 = vpack.c.bf16 %v326_v8, %v323_v6 }
 0x2ac   :  { %v795_v11 = vpop.f32.mrf.mxu1 }
 0x2ad   :  { %801 = vmatprep.mubr.msk.bf16.mxu0 %vm381_vm2, %v354_v9 }
 0x2ae   :  { %v339_v13 = vpop.f32.mrf.mxu1  ;;  %802 = vmatmul.mubr.msk.bf16.vlgmr.msra.gmra.mxu0 %vm381_vm2, %v355_v10 }
 0x2af   :  { %822 = vmatpush3.bf16.msra.mxu0 %v845_v4  ;;  %825 = vmatprep.mubr.msk.bf16.mxu0 %vm381_vm2, %v281_v2 }
 0x2b0   :  { %v796_v14 = vpop.f32.mrf.mxu1  ;;  %823 = vmatprep.subr.bf16.mxu0 %v846_v12 }
 0x2b1   :  { %v357_v17 = vpack.c.bf16 %v796_v14, %v795_v11 }
 0x2b2   :  { %v342_v15 = vpop.f32.mrf.mxu1 }
 0x2b3   :  { %v356_v16 = vpack.c.bf16 %v342_v15, %v339_v13  ;;  %824 = vmatpush3.bf16.msra.mxu0 %v846_v12 }
 0x2b5   :  { %805 = vmatprep.mubr.msk.bf16.mxu1 %vm381_vm2, %v356_v16 }
 0x2b6   :  { %806 = vmatmul.mubr.msk.bf16.vlgmr.msra.gmra.mxu1 %vm381_vm2, %v357_v17  ;;  %826 = vmatmul.mubr.msk.bf16.vlgmr.msra.gmra.mxu0 %vm381_vm2, %v282_v63 }
 0x2b7   :  { %829 = vmatprep.mubr.msk.bf16.mxu0 %vm381_vm2, %v283_v60  ;;  %810 = vmatpush3.bf16.msra.mxu1 %v847_v18 }
 0x2b8   :  { %811 = vmatprep.subr.bf16.mxu1 %v848_v19 }
 0x2bb   :  { %812 = vmatpush3.bf16.msra.mxu1 %v848_v19 }
 0x2be   :  { %830 = vmatmul.mubr.msk.bf16.gmra.mxu0 %vm381_vm2, %v284_v56 }
 0x36e   :  { %v803_v20 = vpop.f32.mrf.mxu0 }
 0x36f   :  { %v437_v26 = vadd.f32 %v803_v20, %v696_v22 }
 0x370   :  { %v428_v21 = vpop.f32.mrf.mxu0 }
 0x371   :  { %v429_v24 = vadd.f32 %v696_v22, %v428_v21  ;;  %v461_v33 = vmax.f32 %v437_v26, 0.0 }
 0x372   :  { %v804_v23 = vpop.f32.mrf.mxu0 }
 0x373   :  { %v440_v25 = vadd.f32 %v804_v23, %v696_v22  ;;  %v459_v31 = vmax.f32 %v429_v24, 0.0 }
 0x374   :  { %v431_v27 = vpop.f32.mrf.mxu0 }
 0x375   :  { %v432_v28 = vadd.f32 %v696_v22, %v431_v27  ;;  %v462_v29 = vmax.f32 %v440_v25, 0.0 }
 0x376   :  { %v807_v30 = vpop.f32.mrf.mxu1  ;;  %v827_v49 = vpop.f32.mrf.mxu0 }
 0x377   :  { %v460_v32 = vmax.f32 %v432_v28, 0.0  ;;  %v468_v36 = vpack.c.bf16 %v462_v29, %v461_v33  ;;  %v453_v40 = vadd.f32 %v807_v30, %v696_v22 }
 0x378   :  { %v444_v34 = vpop.f32.mrf.mxu1  ;;  %v622_v50 = vpop.f32.mrf.mxu0 }
 0x379   :  { %v467_v35 = vpack.c.bf16 %v460_v32, %v459_v31  ;;  %v445_v38 = vadd.f32 %v696_v22, %v444_v34  ;;  %v465_v46 = vmax.f32 %v453_v40, 0.0 }
 0x37a   :  { %v808_v37 = vpop.f32.mrf.mxu1  ;;  %v828_v51 = vpop.f32.mrf.mxu0 }
 0x37b   :  { %v456_v39 = vadd.f32 %v808_v37, %v696_v22  ;;  %813 = vmatprep.mubr.msk.bf16.mxu1 %vm381_vm2, %v467_v35  ;;  %v463_v44 = vmax.f32 %v445_v38, 0.0 }
 0x37c   :  { %v447_v41 = vpop.f32.mrf.mxu1  ;;  %814 = vmatmul.mubr.msk.bf16.vlgmr.msra.gmra.mxu1 %vm381_vm2, %v468_v36  ;;  %v625_v52 = vpop.f32.mrf.mxu0 }
 0x37d   :  { %v448_v42 = vadd.f32 %v696_v22, %v447_v41  ;;  %v466_v43 = vmax.f32 %v456_v39, 0.0 }
 0x37e   :  { %v831_v56 = vpop.f32.mrf.mxu0 }
 0x37f   :  { %v464_v45 = vmax.f32 %v448_v42, 0.0  ;;  %v470_v48 = vpack.c.bf16 %v466_v43, %v465_v46 }
 0x380   :  { %v638_v63 = vpop.f32.mrf.mxu0 }
 0x381   :  { %v469_v47 = vpack.c.bf16 %v464_v45, %v463_v44 }
 0x382   :  { %v832_v6 = vpop.f32.mrf.mxu0 }
 0x383   :  { %817 = vmatprep.mubr.msk.bf16.mxu1 %vm381_vm2, %v469_v47 }
 0x384   :  { %818 = vmatmul.mubr.msk.bf16.gmra.mxu1 %vm381_vm2, %v470_v48  ;;  %v641_v13 = vpop.f32.mrf.mxu0 }
 0x43c   :  { %v815_v53 = vpop.f32.mrf.mxu1 }
 0x43d   :  { %v631_v55 = vadd.f32 %v827_v49, %v815_v53 }
 0x43e   :  { %v533_v57 = vpop.f32.mrf.mxu1 }
 0x43f   :  { %v662_v58 = vadd.f32 %v715_v54, %v631_v55  ;;  %v623_v59 = vadd.f32 %v622_v50, %v533_v57 }
 0x440   :  { %v816_v60 = vpop.f32.mrf.mxu1 }
 0x441   :  { %670 = vst [vmem:[%s1105_s9 + $0x10] sm:$0xff] %v662_v58  ;;  %v660_v61 = vadd.f32 %v715_v54, %v623_v59  ;;  %v634_v62 = vadd.f32 %v828_v51, %v816_v60 }
 0x442   :  { %v536_v0 = vpop.f32.mrf.mxu1 }
 0x443   :  { %668 = vst [vmem:[%s1105_s9] sm:$0xff] %v660_v61  ;;  %v663_v1 = vadd.f32 %v715_v54, %v634_v62  ;;  %v626_v2 = vadd.f32 %v625_v52, %v536_v0 }
 0x444   :  { %v819_v3 = vpop.f32.mrf.mxu1 }
 0x445   :  { %671 = vst [vmem:[%s1105_s9 + $0x18] sm:$0xff] %v663_v1  ;;  %v661_v4 = vadd.f32 %v715_v54, %v626_v2  ;;  %v647_v5 = vadd.f32 %v831_v56, %v819_v3 }
 0x446   :  { %v549_v7 = vpop.f32.mrf.mxu1 }
 0x447   :  { %669 = vst [vmem:[%s1105_s9 + $0x8] sm:$0xff] %v661_v4  ;;  %v666_v8 = vadd.f32 %v715_v54, %v647_v5  ;;  %v639_v9 = vadd.f32 %v638_v63, %v549_v7 }
 0x448   :  { %v820_v10 = vpop.f32.mrf.mxu1 }
 0x449   :  { %674 = vst [vmem:[%s1105_s9 + $0x30] sm:$0xff] %v666_v8  ;;  %v664_v11 = vadd.f32 %v715_v54, %v639_v9  ;;  %v650_v12 = vadd.f32 %v832_v6, %v820_v10 }
 0x44a   :  { %v552_v14 = vpop.f32.mrf.mxu1 }
 0x44b   :  { %672 = vst [vmem:[%s1105_s9 + $0x20] sm:$0xff] %v664_v11  ;;  %v667_v15 = vadd.f32 %v715_v54, %v650_v12  ;;  %v642_v16 = vadd.f32 %v641_v13, %v552_v14 }
 0x44d   :  { %675 = vst [vmem:[%s1105_s9 + $0x38] sm:$0xff] %v667_v15  ;;  %v665_v17 = vadd.f32 %v715_v54, %v642_v16 }
 0x44f   :  { %673 = vst [vmem:[%s1105_s9 + $0x28] sm:$0xff] %v665_v17 }
 0x450   :  { %680 = vsyncpa [#allocation3], 1 }
 0x451   :  { %681 = vsyncpa [#allocation5], 1 }

</bundles_post_ra>
